<compile_context>
chip_gen: v6e
topology: v6e:2x2x1
jax: 0.10.0
libtpu: 0.0.40
codegen_flags: <defaults>
</compile_context>

<pallas_src>
import functools

import jax
import jax.numpy as jnp
from jax.experimental import pallas as pl
from jax.experimental.pallas import tpu as pltpu


def _round_up(x, m):
    return (x + m - 1) // m * m


def _edge_tiling(E, tile_e):
    tile_e = _round_up(max(int(tile_e), 128), 128)
    TILE_E = min(tile_e, _round_up(max(E, 1), 128))
    # v7x: keep >= 2 grid steps for mid/large E so both TensorCores get work
    # along the "parallel" edge axis (harmless on single-TC v5e/v6e).
    if E >= 256:
        TILE_E = min(TILE_E, _round_up((E + 1) // 2, 128))
    TILE_E = max(TILE_E, 128)
    E_pad = _round_up(max(E, 1), TILE_E)
    return TILE_E, E_pad, E_pad // TILE_E


@functools.lru_cache(maxsize=1)
def _vmem_capacity_bytes():
    try:
        return int(pltpu.get_tpu_info().vmem_capacity_bytes)
    except Exception:
        return 64 << 20  # conservative default: v7x per-TensorCore VMEM


def _pad_rows(tab, mult):
    """Pad rows up to a multiple of `mult`; only copies when actually needed."""
    n, h = tab.shape
    n_pad = _round_up(max(n, 1), mult)
    if n_pad == n:
        return tab
    return jnp.concatenate([tab, jnp.zeros((n_pad - n, h), tab.dtype)], axis=0)


def _fused_resident_bytes(U, I, H, TILE_E, compute_dtype, single_buffer):
    """VMEM residency estimate for the fused (table-resident) path."""
    itemsize = jnp.dtype(compute_dtype).itemsize
    row_mult = 8 * max(1, 4 // itemsize)            # 8 for f32, 16 for bf16
    U_pad = _round_up(max(U, 1), row_mult)
    I_pad = _round_up(max(I, 1), row_mult)
    bufs = 1 if single_buffer else 2
    return int((U_pad + I_pad) * H * itemsize * bufs          # tables
               + (2 * H * H * itemsize + 2 * H * 4) * bufs    # w1u/w1i, b1, w2
               + 2 * 2 * TILE_E * 4                           # row/col blocks x2
               + 2 * TILE_E * 4                               # output blocks x2
               + TILE_E * H * (2 * itemsize + 8)              # zu/zi + h/s temps
               + (2 << 20))                                    # slack


# ----------------------------- kernel bodies --------------------------------

def _mlp_tile(zu, zi, w1u, w1i, b1, w2, b2_scalar):
    """relu(cat([zu, zi]) @ W1.T + b1) @ W2.T + b2 with the concat folded.

    Returns a lane-dense (1, TILE_E) row of f32 scores.
    """
    h = (jnp.dot(zu, w1u, preferred_element_type=jnp.float32)
         + jnp.dot(zi, w1i, preferred_element_type=jnp.float32)
         + b1)                                    # (TILE_E, H) f32
    h = jnp.maximum(h, 0.0)
    # lin2 has a single output feature: contract as (1,H) x (TILE_E,H)^T so the
    # scores land lane-dense in (1, TILE_E) -> unmasked full-lane stores instead
    # of TILE_E/8 masked (TILE_E,1) partial stores.  Rides the otherwise idle MXU.
    s = jax.lax.dot_general(w2, h, (((1,), (1,)), ((), ())),
                            preferred_element_type=jnp.float32)
    return s + b2_scalar


def _fused_kernel(row_ref, col_ref, zu_tab_ref, zi_tab_ref,
                  w1u_ref, w1i_ref, b1_ref, w2_ref, b2_ref, out_ref):
    # In-kernel gather: the embedding tables stay VMEM-resident across grid
    # steps and edge rows are picked per tile -- no jnp.take -> HBM -> re-read
    # round trip.  (TILE_E, 1) indices broadcast across the H lanes.
    zu = jnp.take_along_axis(zu_tab_ref[...], row_ref[...], axis=0)  # (TILE_E, H)
    zi = jnp.take_along_axis(zi_tab_ref[...], col_ref[...], axis=0)  # (TILE_E, H)
    out_ref[...] = _mlp_tile(zu, zi, w1u_ref[...], w1i_ref[...], b1_ref[...],
                             w2_ref[...], b2_ref[0, 0])


def _streaming_kernel(zu_ref, zi_ref, w1u_ref, w1i_ref, b1_ref, w2_ref,
                      b2_ref, out_ref):
    out_ref[...] = _mlp_tile(zu_ref[...], zi_ref[...], w1u_ref[...],
                             w1i_ref[...], b1_ref[...], w2_ref[...],
                             b2_ref[0, 0])


# ------------------------------- wrappers ------------------------------------

def _forward_fused(z_user, z_item, row, col, w1u, w1i, b1r, w2r, b2r, *,
                   tile_e, compute_dtype, single_buffer):
    H = z_user.shape[-1]
    E = int(row.shape[0])
    TILE_E, E_pad, G = _edge_tiling(E, tile_e)

    itemsize = jnp.dtype(compute_dtype).itemsize
    row_mult = 8 * max(1, 4 // itemsize)
    zu_tab = _pad_rows(z_user.astype(compute_dtype), row_mult)
    zi_tab = _pad_rows(z_item.astype(compute_dtype), row_mult)
    U_pad, I_pad = zu_tab.shape[0], zi_tab.shape[0]

    if E_pad == E:
        row_col = row.reshape(E, 1)
        col_col = col.reshape(E, 1)
    else:  # padded tail indices point at (valid) row 0; sliced off below
        row_col = jnp.zeros((E_pad, 1), jnp.int32).at[:E, 0].set(row)
        col_col = jnp.zeros((E_pad, 1), jnp.int32).at[:E, 0].set(col)

    # Grid-invariant operands (constant index_map): single-buffer them so they
    # are resident exactly once in VMEM.
    const_kw = {"pipeline_mode": pl.Buffered(1)} if single_buffer else {}

    resident = _fused_resident_bytes(z_user.shape[0], z_item.shape[0], H,
                                     TILE_E, compute_dtype, single_buffer)
    cap = _vmem_capacity_bytes()
    vmem_limit = int(min(0.9 * cap, max(2 * resident, 32 << 20)))

    cost = pl.CostEstimate(
        flops=4 * E_pad * H * H + 2 * E_pad * H,
        transcendentals=0,
        bytes_accessed=int((U_pad + I_pad) * H * itemsize + 3 * E_pad * 4
                           + 2 * H * H * itemsize + 3 * H * 4),
    )

    out = pl.pallas_call(
        _fused_kernel,
        out_shape=jax.ShapeDtypeStruct((1, E_pad), jnp.float32),
        grid=(G,),
        in_specs=[
            pl.BlockSpec((TILE_E, 1), lambda i: (i, 0)),                 # row ids
            pl.BlockSpec((TILE_E, 1), lambda i: (i, 0)),                 # col ids
            pl.BlockSpec((U_pad, H), lambda i: (0, 0), **const_kw),      # user tab
            pl.BlockSpec((I_pad, H), lambda i: (0, 0), **const_kw),      # item tab
            pl.BlockSpec((H, H), lambda i: (0, 0), **const_kw),          # w1u
            pl.BlockSpec((H, H), lambda i: (0, 0), **const_kw),          # w1i
            pl.BlockSpec((1, H), lambda i: (0, 0), **const_kw),          # b1
            pl.BlockSpec((1, H), lambda i: (0, 0), **const_kw),          # w2 row
            pl.BlockSpec(memory_space=pltpu.MemorySpace.SMEM),           # b2
        ],
        out_specs=pl.BlockSpec((1, TILE_E), lambda i: (0, i)),
        compiler_params=pltpu.CompilerParams(
            dimension_semantics=("parallel",),
            vmem_limit_bytes=vmem_limit),
        cost_estimate=cost,
    )(row_col, col_col, zu_tab, zi_tab, w1u, w1i, b1r, w2r, b2r)
    return out[0, :E]


def _forward_streaming(z_user, z_item, row, col, w1u, w1i, b1r, w2r, b2r, *,
                       tile_e, compute_dtype):
    H = z_user.shape[-1]
    E = int(row.shape[0])
    TILE_E, E_pad, G = _edge_tiling(E, tile_e)

    # Pad only the (tiny) index vectors; the XLA gather then writes (E_pad, H)
    # directly instead of a separate zero-pad + copy of the gathered rows.
    if E_pad != E:
        row = jnp.zeros((E_pad,), jnp.int32).at[:E].set(row)
        col = jnp.zeros((E_pad,), jnp.int32).at[:E].set(col)
    zu = jnp.take(z_user.astype(compute_dtype), row, axis=0)   # (E_pad, H)
    zi = jnp.take(z_item.astype(compute_dtype), col, axis=0)   # (E_pad, H)

    itemsize = jnp.dtype(compute_dtype).itemsize
    resident = (2 * 2 * TILE_E * H * itemsize            # zu/zi blocks x2 bufs
                + 2 * (2 * H * H * itemsize + 2 * H * 4)  # weights x2 bufs
                + 2 * TILE_E * 4                          # output blocks x2 bufs
                + TILE_E * H * 8                          # h / s f32 temporaries
                + (2 << 20))
    cap = _vmem_capacity_bytes()
    vmem_limit = int(min(0.9 * cap, max(2 * resident, 32 << 20)))

    cost = pl.CostEstimate(
        flops=4 * E_pad * H * H + 2 * E_pad * H,
        transcendentals=0,
        bytes_accessed=int(2 * E_pad * H * itemsize + E_pad * 4
                           + 2 * H * H * itemsize + 3 * H * 4),
    )

    out = pl.pallas_call(
        _streaming_kernel,
        out_shape=jax.ShapeDtypeStruct((1, E_pad), jnp.float32),
        grid=(G,),
        in_specs=[
            pl.BlockSpec((TILE_E, H), lambda i: (i, 0)),
            pl.BlockSpec((TILE_E, H), lambda i: (i, 0)),
            pl.BlockSpec((H, H), lambda i: (0, 0)),
            pl.BlockSpec((H, H), lambda i: (0, 0)),
            pl.BlockSpec((1, H), lambda i: (0, 0)),
            pl.BlockSpec((1, H), lambda i: (0, 0)),
            pl.BlockSpec(memory_space=pltpu.MemorySpace.SMEM),
        ],
        out_specs=pl.BlockSpec((1, TILE_E), lambda i: (0, i)),
        compiler_params=pltpu.CompilerParams(
            dimension_semantics=("parallel",),
            vmem_limit_bytes=vmem_limit),
        cost_estimate=cost,
    )(zu, zi, w1u, w1i, b1r, w2r, b2r)
    return out[0, :E]


@functools.lru_cache(maxsize=None)
def _fused_mode(dtype_name):
    """Capability probe for the fused (in-kernel gather) path.

    Runs the fused kernel once on tiny inputs, eagerly, and value-checks it so
    a mis-lowered gather is caught (not just a raised lowering error).
    Returns True (Buffered(1) works) / False (default buffering works) / None
    (fused path unavailable -> use the streaming fallback).
    """
    compute_dtype = jnp.dtype(dtype_name)
    H, U, I, E = 32, 16, 16, 16
    k1, k2 = jax.random.split(jax.random.PRNGKey(1234))
    zu = jax.random.normal(k1, (U, H), jnp.float32)
    zi = jax.random.normal(k2, (I, H), jnp.float32)
    row = jnp.arange(E, dtype=jnp.int32) % U
    col = (3 * jnp.arange(E, dtype=jnp.int32)) % I
    w1u = jnp.eye(H, dtype=jnp.float32).astype(compute_dtype)
    w1i = (0.5 * jnp.eye(H, dtype=jnp.float32)).astype(compute_dtype)
    b1r = jnp.full((1, H), 0.25, jnp.float32)
    w2r = jnp.ones((1, H), jnp.float32)
    b2r = jnp.zeros((1, 1), jnp.float32)
    zu_cd = zu.astype(compute_dtype).astype(jnp.float32)
    zi_cd = zi.astype(compute_dtype).astype(jnp.float32)
    want = jnp.sum(jnp.maximum(zu_cd[row] + 0.5 * zi_cd[col] + 0.25, 0.0), -1)
    for single_buffer in (True, False):
        try:
            got = _forward_fused(zu, zi, row, col, w1u, w1i, b1r, w2r, b2r,
                                 tile_e=128, compute_dtype=compute_dtype,
                                 single_buffer=single_buffer)
            got = jax.block_until_ready(got)
            if bool(jnp.allclose(got, want, atol=1e-3, rtol=1e-3)):
                return single_buffer
        except Exception:
            pass
    return None


def edge_decoder_forward(z_user, z_item, edge_label_index, params, *,
                         tile_e=None, compute_dtype=jnp.bfloat16,
                         fuse_gather=True):
    """z_user: (U, H), z_item: (I, H), edge_label_index: (2, E) int.

    compute_dtype=bfloat16 (default) halves HBM/VMEM bytes for tables,
    gathered rows and W1 (accumulation stays f32).  Pass jnp.float32 for
    tight parity with the PyTorch reference.
    """
    W1, b1, W2, b2 = params["W1"], params["b1"], params["W2"], params["b2"]
    H = z_user.shape[-1]
    row = edge_label_index[0].astype(jnp.int32)
    col = edge_label_index[1].astype(jnp.int32)
    E = int(row.shape[0])

    # Fold the concat: cat([zu, zi]) @ W1.T == zu @ W1[:, :H].T + zi @ W1[:, H:].T
    w1u = W1[:, :H].T.astype(compute_dtype)            # (H, H)
    w1i = W1[:, H:].T.astype(compute_dtype)            # (H, H)
    b1r = b1.reshape(1, H).astype(jnp.float32)         # (1, H)
    w2r = W2.reshape(1, H).astype(jnp.float32)         # (1, H)
    b2r = b2.reshape(1, 1).astype(jnp.float32)         # (1, 1) -> SMEM scalar

    if fuse_gather:
        tile_fused = 1024 if tile_e is None else tile_e
        mode = _fused_mode(jnp.dtype(compute_dtype).name)
        if mode is not None:
            TILE_E, _, _ = _edge_tiling(E, tile_fused)
            resident = _fused_resident_bytes(z_user.shape[0], z_item.shape[0],
                                             H, TILE_E, compute_dtype, mode)
            # Only take the table-resident path when it fits comfortably
            # (v7x: 64 MiB per TensorCore; v5e/v6e: 128 MiB).
            if resident <= int(0.75 * _vmem_capacity_bytes()):
                return _forward_fused(z_user, z_item, row, col, w1u, w1i,
                                      b1r, w2r, b2r, tile_e=tile_fused,
                                      compute_dtype=compute_dtype,
                                      single_buffer=mode)

    tile_stream = 4096 if tile_e is None else tile_e
    return _forward_streaming(z_user, z_item, row, col, w1u, w1i, b1r, w2r,
                              b2r, tile_e=tile_stream,
                              compute_dtype=compute_dtype)


# ------------------------------- reference -----------------------------------

def init_params(key, hidden_channels):
    """Deterministic synthetic parameters (same shapes as torch Linear)."""
    k1, k2, k3, k4 = jax.random.split(key, 4)
    H = hidden_channels
    # torch.nn.Linear: weight (out_features, in_features), bias (out_features,)
    W1 = jax.random.normal(k1, (H, 2 * H), dtype=jnp.float32) * 0.1
    b1 = jax.random.normal(k2, (H,), dtype=jnp.float32) * 0.1
    W2 = jax.random.normal(k3, (1, H), dtype=jnp.float32) * 0.1
    b2 = jax.random.normal(k4, (1,), dtype=jnp.float32) * 0.1
    return {"W1": W1, "b1": b1, "W2": W2, "b2": b2}


def reference_forward(z_user, z_item, edge_label_index, params):
    """Pure-JAX reference mirroring the PyTorch forward."""
    row, col = edge_label_index[0], edge_label_index[1]
    z = jnp.concatenate([z_user[row], z_item[col]], axis=-1)
    z = jnp.maximum(z @ params["W1"].T + params["b1"], 0.0)
    z = z @ params["W2"].T + params["b2"]
    return z.reshape(-1)


if __name__ == "__main__":
    key = jax.random.PRNGKey(0)
    k_u, k_i, k_r, k_c, k_p = jax.random.split(key, 5)

    hidden = 32
    num_users, num_items, num_edges = 6, 5, 8

    z_user = jax.random.normal(k_u, (num_users, hidden), dtype=jnp.float32)
    z_item = jax.random.normal(k_i, (num_items, hidden), dtype=jnp.float32)
    row = jax.random.randint(k_r, (num_edges,), 0, num_users, dtype=jnp.int32)
    col = jax.random.randint(k_c, (num_edges,), 0, num_items, dtype=jnp.int32)
    edge_label_index = jnp.stack([row, col], axis=0)   # (2, E)

    params = init_params(k_p, hidden)
    ref = reference_forward(z_user, z_item, edge_label_index, params)

    # f32 parity mode: exact match with the PyTorch-style reference.
    out_f32 = edge_decoder_forward(z_user, z_item, edge_label_index, params,
                                   compute_dtype=jnp.float32)
    out_f32 = jax.block_until_ready(out_f32)
    assert out_f32.shape == (num_edges,)
    assert jnp.allclose(out_f32, ref, atol=1e-5, rtol=1e-5), (out_f32, ref)

    # Default bf16 fast mode (f32 accumulation): looser tolerance.
    out_bf16 = edge_decoder_forward(z_user, z_item, edge_label_index, params)
    out_bf16 = jax.block_until_ready(out_bf16)
    assert out_bf16.shape == (num_edges,)
    assert jnp.allclose(out_bf16, ref, atol=5e-2, rtol=5e-2), (out_bf16, ref)

    print("KERNEL_OK")
</pallas_src>

<mosaic_0001>
module attributes {stable_mosaic.version = 11 : i64} {
  func.func @_streaming_kernel(%arg0: i32, %arg1: memref<128x32xf32, #tpu.memory_space<vmem>>, %arg2: memref<128x32xf32, #tpu.memory_space<vmem>>, %arg3: memref<32x32xf32, #tpu.memory_space<vmem>>, %arg4: memref<32x32xf32, #tpu.memory_space<vmem>>, %arg5: memref<1x32xf32, #tpu.memory_space<vmem>>, %arg6: memref<1x32xf32, #tpu.memory_space<vmem>>, %arg7: memref<1x1xf32, #tpu.memory_space<smem>>, %arg8: memref<1x128xf32, #tpu.memory_space<vmem>>) attributes {dimension_semantics = [#tpu.dimension_semantics<parallel>], iteration_bounds = array<i64: 1>, scalar_prefetch = 0 : i64, scratch_operands = 0 : i64, tpu.core_type = #tpu.core_type<tc>, window_params = [{transform_indices = @transform_0, window_bounds = array<i64: 128, 32>}, {transform_indices = @transform_1, window_bounds = array<i64: 128, 32>}, {pipeline_mode = #tpu.pipeline_mode<synchronous>, transform_indices = @transform_2, window_bounds = array<i64: 32, 32>}, {pipeline_mode = #tpu.pipeline_mode<synchronous>, transform_indices = @transform_3, window_bounds = array<i64: 32, 32>}, {pipeline_mode = #tpu.pipeline_mode<synchronous>, transform_indices = @transform_4, window_bounds = array<i64: 1, 32>}, {pipeline_mode = #tpu.pipeline_mode<synchronous>, transform_indices = @transform_5, window_bounds = array<i64: 1, 32>}, {transform_indices = @transform_6, window_bounds = array<i64: 1, 1>}, {transform_indices = @transform_7, window_bounds = array<i64: 1, 128>}]} {
    %c0 = arith.constant 0 : index
    %c0_0 = arith.constant 0 : index
    %0 = vector.load %arg1[%c0, %c0_0] : memref<128x32xf32, #tpu.memory_space<vmem>>, vector<128x32xf32>
    %c0_1 = arith.constant 0 : index
    %c0_2 = arith.constant 0 : index
    %1 = vector.load %arg2[%c0_1, %c0_2] : memref<128x32xf32, #tpu.memory_space<vmem>>, vector<128x32xf32>
    %c0_3 = arith.constant 0 : index
    %c0_4 = arith.constant 0 : index
    %2 = vector.load %arg3[%c0_3, %c0_4] : memref<32x32xf32, #tpu.memory_space<vmem>>, vector<32x32xf32>
    %c0_5 = arith.constant 0 : index
    %c0_6 = arith.constant 0 : index
    %3 = vector.load %arg4[%c0_5, %c0_6] : memref<32x32xf32, #tpu.memory_space<vmem>>, vector<32x32xf32>
    %c0_7 = arith.constant 0 : index
    %c0_8 = arith.constant 0 : index
    %4 = vector.load %arg5[%c0_7, %c0_8] : memref<1x32xf32, #tpu.memory_space<vmem>>, vector<1x32xf32>
    %c0_9 = arith.constant 0 : index
    %c0_10 = arith.constant 0 : index
    %5 = vector.load %arg6[%c0_9, %c0_10] : memref<1x32xf32, #tpu.memory_space<vmem>>, vector<1x32xf32>
    %c0_11 = arith.constant 0 : index
    %c0_12 = arith.constant 0 : index
    %6 = memref.load %arg7[%c0_11, %c0_12] : memref<1x1xf32, #tpu.memory_space<smem>>
    %cst = arith.constant dense<0.000000e+00> : vector<128x32xf32>
    %7 = tpu.matmul %0, %2, %cst {dimension_numbers = #tpu.dot_dimension_numbers<[1], [0], [0], [1], [0, 0, 1, 1], [], []>} : vector<128x32xf32>, vector<32x32xf32>, vector<128x32xf32> -> vector<128x32xf32>
    %cst_13 = arith.constant dense<0.000000e+00> : vector<128x32xf32>
    %8 = tpu.matmul %1, %3, %cst_13 {dimension_numbers = #tpu.dot_dimension_numbers<[1], [0], [0], [1], [0, 0, 1, 1], [], []>} : vector<128x32xf32>, vector<32x32xf32>, vector<128x32xf32> -> vector<128x32xf32>
    %9 = arith.addf %7, %8 : vector<128x32xf32>
    %10 = vector.broadcast %4 : vector<1x32xf32> to vector<128x32xf32>
    %11 = arith.addf %9, %10 : vector<128x32xf32>
    %cst_14 = arith.constant 0.000000e+00 : f32
    %12 = vector.broadcast %cst_14 : f32 to vector<128x32xf32>
    %13 = arith.maximumf %11, %12 : vector<128x32xf32>
    %cst_15 = arith.constant dense<0.000000e+00> : vector<1x128xf32>
    %14 = tpu.matmul %5, %13, %cst_15 {dimension_numbers = #tpu.dot_dimension_numbers<[1], [1], [0], [0], [0, 0, 1, 0], [], []>} : vector<1x32xf32>, vector<128x32xf32>, vector<1x128xf32> -> vector<1x128xf32>
    %15 = vector.broadcast %6 : f32 to vector<1x128xf32>
    %16 = arith.addf %14, %15 : vector<1x128xf32>
    %c0_16 = arith.constant 0 : index
    %c0_17 = arith.constant 0 : index
    %17 = vector.load %arg8[%c0_16, %c0_17] : memref<1x128xf32, #tpu.memory_space<vmem>>, vector<1x128xf32>
    tpu.vector_store %arg8[%c0_16, %c0_17], %16 {strides = array<i32>} : memref<1x128xf32, #tpu.memory_space<vmem>>, vector<1x128xf32>,
    return
  }
  func.func @transform_0(%arg0: i32) -> (i32, i32) {
    %c0_i32 = arith.constant 0 : i32
    %c0_i32_0 = arith.constant 0 : i32
    return %arg0, %c0_i32 : i32, i32
  }
  func.func @transform_1(%arg0: i32) -> (i32, i32) {
    %c0_i32 = arith.constant 0 : i32
    %c0_i32_0 = arith.constant 0 : i32
    return %arg0, %c0_i32 : i32, i32
  }
  func.func @transform_2(%arg0: i32) -> (i32, i32) {
    %c0_i32 = arith.constant 0 : i32
    %c0_i32_0 = arith.constant 0 : i32
    %c0_i32_1 = arith.constant 0 : i32
    return %c0_i32, %c0_i32_0 : i32, i32
  }
  func.func @transform_3(%arg0: i32) -> (i32, i32) {
    %c0_i32 = arith.constant 0 : i32
    %c0_i32_0 = arith.constant 0 : i32
    %c0_i32_1 = arith.constant 0 : i32
    return %c0_i32, %c0_i32_0 : i32, i32
  }
  func.func @transform_4(%arg0: i32) -> (i32, i32) {
    %c0_i32 = arith.constant 0 : i32
    %c0_i32_0 = arith.constant 0 : i32
    %c0_i32_1 = arith.constant 0 : i32
    return %c0_i32, %c0_i32_0 : i32, i32
  }
  func.func @transform_5(%arg0: i32) -> (i32, i32) {
    %c0_i32 = arith.constant 0 : i32
    %c0_i32_0 = arith.constant 0 : i32
    %c0_i32_1 = arith.constant 0 : i32
    return %c0_i32, %c0_i32_0 : i32, i32
  }
  func.func @transform_6(%arg0: i32) -> (i32, i32) {
    %c0_i32 = arith.constant 0 : i32
    %c0_i32_0 = arith.constant 0 : i32
    %c0_i32_1 = arith.constant 0 : i32
    return %c0_i32, %c0_i32_0 : i32, i32
  }
  func.func @transform_7(%arg0: i32) -> (i32, i32) {
    %c0_i32 = arith.constant 0 : i32
    %c0_i32_0 = arith.constant 0 : i32
    return %c0_i32, %arg0 : i32, i32
  }
}

</mosaic_0001>

<bundles_post_ra>
// kernel: tpu_custom_call.1
= control target key start
LH: loop header
LB: loop body
LE: loop exit
PB: predicated region body
PF: predicated region fallthrough
CT: control target
= control target key end

     0   :  { %vm71_vm0 = vcmask 261120   ;;  %s1147_s0 = inlined_call_operand.vmem [shape: f32[128,32], index: 0, kind: input, shape index: {}]   ;;  %s1148_s1 = inlined_call_operand.vmem [shape: f32[128,32], index: 1, kind: input, shape index: {}]   ;;  %s1149_s2 = inlined_call_operand.vmem [shape: f32[32,32], index: 2, kind: input, shape index: {}]   ;;  %s1150_s3 = inlined_call_operand.vmem [shape: f32[32,32], index: 3, kind: input, shape index: {}]   ;;  %s1151_s4 = inlined_call_operand.vmem [shape: f32[1,32], index: 4, kind: input, shape index: {}]   ;;  %s1152_s5 = inlined_call_operand.vmem [shape: f32[1,32], index: 5, kind: input, shape index: {}]   ;;  %s1153_s6 = inlined_call_operand.<no memory space> [shape: f32[1,1], index: 6, kind: input, shape index: {}]   ;;  %s1154_s7 = inlined_call_operand.hbm [shape: f32[1,128], index: 7, kind: output, shape index: {}]  }
   0x1   :  { %v67_v0 = vld [vmem:[%s1150_s3 + $0x18] sm:$0xff]  ;;  %v66_v1 = vld [vmem:[%s1150_s3 + $0x10] sm:$0xff]  ;;  %v44_v2 = vld [vmem:[%s1148_s1] sm:$0xff] }
   0x2   :  { %740 = vmatprep.subr.mxu1 %v67_v0  ;;  %v65_v3 = vld [vmem:[%s1150_s3 + $0x8] sm:$0xff]  ;;  %748 = vmatprep.mubr.msk.f32.mxu1 %vm71_vm0, %v44_v2  ;;  %v64_v4 = vld [vmem:[%s1150_s3] sm:$0xff]  ;;  %v63_v6 = vld [vmem:[%s1149_s2 + $0x18] sm:$0xff] }
   0x3   :  { %741 = vmatpush3.msra.mxu1 %v67_v0  ;;  %v45_v5 = vld [vmem:[%s1148_s1 + $0x8] sm:$0xff]  ;;  %v46_v7 = vld [vmem:[%s1148_s1 + $0x10] sm:$0xff]  ;;  %v47_v9 = vld [vmem:[%s1148_s1 + $0x18] sm:$0xff] }
   0x4   :  { %742 = vmatprep.subr.mxu1 %v66_v1  ;;  %v62_v8 = vld [vmem:[%s1149_s2 + $0x10] sm:$0xff]  ;;  %v61_v10 = vld [vmem:[%s1149_s2 + $0x8] sm:$0xff]  ;;  %v48_v11 = vld [vmem:[%s1148_s1 + $0x20] sm:$0xff] }
   0x5   :  { %743 = vmatpush3.msra.mxu1 %v66_v1  ;;  %v60_v12 = vld [vmem:[%s1149_s2] sm:$0xff] }
   0x6   :  { %744 = vmatprep.subr.mxu1 %v65_v3 }
   0x7   :  { %745 = vmatpush3.msra.mxu1 %v65_v3 }
   0x8   :  { %746 = vmatprep.subr.mxu1 %v64_v4 }
   0x9   :  { %747 = vmatpush3.msra.mxu1 %v64_v4 }
   0xa   :  { %749 = vmatmul.mubr.msk.f32.vlgmr.msra.gmra.mxu1 %vm71_vm0, %v45_v5  ;;  %772 = vmatprep.subr.mxu1 %v63_v6 }
   0xb   :  { %773 = vmatpush3.msra.mxu1 %v63_v6  ;;  %751 = vmatprep.mubr.msk.f32.mxu1 %vm71_vm0, %v46_v7 }
   0xc   :  { %774 = vmatprep.subr.mxu1 %v62_v8 }
   0xd   :  { %775 = vmatpush3.msra.mxu1 %v62_v8 }
   0xe   :  { %752 = vmatmul.mubr.msk.f32.gmra.mxu1 %vm71_vm0, %v47_v9  ;;  %776 = vmatprep.subr.mxu1 %v61_v10 }
   0xf   :  { %13 = vsyncpa [#allocation4], 0  ;;  %754 = vmatprep.mubr.msk.f32.mxu1 %vm71_vm0, %v48_v11  ;;  %v49_v13 = vld [vmem:[%s1148_s1 + $0x28] sm:$0xff]  ;;  %777 = vmatpush3.msra.mxu1 %v61_v10  ;;  %v50_v14 = vld [vmem:[%s1148_s1 + $0x30] sm:$0xff]  ;;  %v864_v40 = vmov 0.0   ;;  %vm865_vm1 = vmmov 0  }
  0x10   :  { %778 = vmatprep.subr.mxu1 %v60_v12  ;;  %v51_v15 = vld [vmem:[%s1148_s1 + $0x38] sm:$0xff]  ;;  %v52_v16 = vld [vmem:[%s1148_s1 + $0x40] sm:$0xff]  ;;  %v53_v17 = vld [vmem:[%s1148_s1 + $0x48] sm:$0xff]  ;;  %804 = vmatprep.subr.mxu0 %v864_v40  ;;  %s866_s8 = smov [#allocation3]  }
  0x11   :  { %779 = vmatpush3.msra.mxu1 %v60_v12  ;;  %v54_v18 = vld [vmem:[%s1148_s1 + $0x50] sm:$0xff]  ;;  %v55_v19 = vld [vmem:[%s1148_s1 + $0x58] sm:$0xff]  ;;  %v56_v20 = vld [vmem:[%s1148_s1 + $0x60] sm:$0xff]  ;;  %836 = vmatprep.mubr.msk.f32.mxu0 %vm865_vm1, %v864_v40  ;;  %s625_s9 = sshll.u32 %s866_s8, 4  ;;  %s626_s9 = int_to_ptr.vmem [resolvable:$true] %s625_s9 }
  0x12   :  { %755 = vmatmul.mubr.msk.f32.gmra.mxu1 %vm71_vm0, %v49_v13  ;;  %v57_v21 = vld [vmem:[%s1148_s1 + $0x68] sm:$0xff]  ;;  %v58_v22 = vld [vmem:[%s1148_s1 + $0x70] sm:$0xff]  ;;  %v59_v23 = vld [vmem:[%s1148_s1 + $0x78] sm:$0xff]  ;;  %s842_s10 = scalar_lea.vmem %s626_s9, 16  ;;  %s846_s11 = scalar_lea.vmem %s626_s9, 32 }
  0x13   :  { %757 = vmatprep.mubr.msk.f32.mxu1 %vm71_vm0, %v50_v14  ;;  %v28_v24 = vld [vmem:[%s1147_s0] sm:$0xff]  ;;  %v29_v25 = vld [vmem:[%s1147_s0 + $0x8] sm:$0xff]  ;;  %v30_v26 = vld [vmem:[%s1147_s0 + $0x10] sm:$0xff]  ;;  %p843_p0 = scmp.ne.s32.totalorder %s626_s9, %s842_s10  ;;  %p847_p1 = scmp.lt.s32.totalorder %s626_s9, %s626_s9 }
  0x14   :  { %v31_v27 = vld [vmem:[%s1147_s0 + $0x18] sm:$0xff]  ;;  %v32_v28 = vld [vmem:[%s1147_s0 + $0x20] sm:$0xff]  ;;  %v33_v29 = vld [vmem:[%s1147_s0 + $0x28] sm:$0xff]  ;;  %p848_p2 = scmp.lt.s32.totalorder %s846_s11, %s842_s10 }
  0x15   :  { %v34_v30 = vld [vmem:[%s1147_s0 + $0x30] sm:$0xff]  ;;  %v35_v31 = vld [vmem:[%s1147_s0 + $0x38] sm:$0xff]  ;;  %v36_v32 = vld [vmem:[%s1147_s0 + $0x40] sm:$0xff] }
  0x16   :  { %758 = vmatmul.mubr.msk.f32.gmra.mxu1 %vm71_vm0, %v51_v15  ;;  %v37_v33 = vld [vmem:[%s1147_s0 + $0x48] sm:$0xff]  ;;  %v38_v34 = vld [vmem:[%s1147_s0 + $0x50] sm:$0xff]  ;;  %v39_v35 = vld [vmem:[%s1147_s0 + $0x58] sm:$0xff]  ;;  %p849_p3 = por %p848_p2, %p847_p1 }
  0x17   :  { %760 = vmatprep.mubr.msk.f32.mxu1 %vm71_vm0, %v52_v16  ;;  %v40_v36 = vld [vmem:[%s1147_s0 + $0x60] sm:$0xff]  ;;  %v41_v37 = vld [vmem:[%s1147_s0 + $0x68] sm:$0xff]  ;;  %v42_v38 = vld [vmem:[%s1147_s0 + $0x70] sm:$0xff] }
  0x18   :  { %v43_v39 = vld [vmem:[%s1147_s0 + $0x78] sm:$0xff]  ;;  %v1080_v13 = vld [vmem:[%s1151_s4] ss:$0 sm:$0xff]  ;;  %p850_p4 = pnand %p849_p3, %p843_p0 }
  0x1a   :  { %761 = vmatmul.mubr.msk.f32.gmra.mxu1 %vm71_vm0, %v53_v17 }
  0x1b   :  { %763 = vmatprep.mubr.msk.f32.mxu1 %vm71_vm0, %v54_v18 }
  0x1e   :  { %764 = vmatmul.mubr.msk.f32.gmra.mxu1 %vm71_vm0, %v55_v19 }
  0x1f   :  { %766 = vmatprep.mubr.msk.f32.mxu1 %vm71_vm0, %v56_v20 }
  0x22   :  { %767 = vmatmul.mubr.msk.f32.gmra.mxu1 %vm71_vm0, %v57_v21 }
  0x23   :  { %769 = vmatprep.mubr.msk.f32.mxu1 %vm71_vm0, %v58_v22 }
  0x26   :  { %770 = vmatmul.mubr.msk.f32.gmra.mxu1 %vm71_vm0, %v59_v23 }
  0x27   :  { %780 = vmatprep.mubr.msk.f32.mxu1 %vm71_vm0, %v28_v24 }
  0x2a   :  { %781 = vmatmul.mubr.msk.f32.vlgmr.msra.gmra.mxu1 %vm71_vm0, %v29_v25 }
  0x2b   :  { %783 = vmatprep.mubr.msk.f32.mxu1 %vm71_vm0, %v30_v26 }
  0x2e   :  { %784 = vmatmul.mubr.msk.f32.gmra.mxu1 %vm71_vm0, %v31_v27 }
  0x2f   :  { %786 = vmatprep.mubr.msk.f32.mxu1 %vm71_vm0, %v32_v28 }
  0x32   :  { %787 = vmatmul.mubr.msk.f32.gmra.mxu1 %vm71_vm0, %v33_v29 }
  0x33   :  { %789 = vmatprep.mubr.msk.f32.mxu1 %vm71_vm0, %v34_v30 }
  0x36   :  { %790 = vmatmul.mubr.msk.f32.gmra.mxu1 %vm71_vm0, %v35_v31 }
  0x37   :  { %792 = vmatprep.mubr.msk.f32.mxu1 %vm71_vm0, %v36_v32 }
  0x3a   :  { %793 = vmatmul.mubr.msk.f32.gmra.mxu1 %vm71_vm0, %v37_v33 }
  0x3b   :  { %795 = vmatprep.mubr.msk.f32.mxu1 %vm71_vm0, %v38_v34 }
  0x3e   :  { %796 = vmatmul.mubr.msk.f32.gmra.mxu1 %vm71_vm0, %v39_v35 }
  0x3f   :  { %798 = vmatprep.mubr.msk.f32.mxu1 %vm71_vm0, %v40_v36 }
  0x42   :  { %799 = vmatmul.mubr.msk.f32.gmra.mxu1 %vm71_vm0, %v41_v37 }
  0x43   :  { %801 = vmatprep.mubr.msk.f32.mxu1 %vm71_vm0, %v42_v38 }
  0x46   :  { %802 = vmatmul.mubr.msk.f32.gmra.mxu1 %vm71_vm0, %v43_v39 }
  0xca   :  { %v750_v41 = vpop.f32.mrf.mxu1 }
  0xcc   :  { %v186_v42 = vpop.f32.mrf.mxu1 }
  0xce   :  { %v753_v43 = vpop.f32.mrf.mxu1 }
  0xd0   :  { %v196_v44 = vpop.f32.mrf.mxu1 }
  0xd2   :  { %v1061_v45 = vpop.f32.mrf.mxu1 }
  0xd4   :  { %v1063_v46 = vpop.f32.mrf.mxu1 }
  0xd6   :  { %v1065_v47 = vpop.f32.mrf.mxu1 }
  0xd8   :  { %v1067_v48 = vpop.f32.mrf.mxu1 }
  0xda   :  { %v762_v49 = vpop.f32.mrf.mxu1 }
  0xdc   :  { %v226_v50 = vpop.f32.mrf.mxu1 }
  0xde   :  { %v765_v51 = vpop.f32.mrf.mxu1 }
  0xe0   :  { %v236_v52 = vpop.f32.mrf.mxu1 }
  0xe2   :  { %v768_v53 = vpop.f32.mrf.mxu1 }
  0xe4   :  { %v246_v54 = vpop.f32.mrf.mxu1 }
  0xe6   :  { %v771_v55 = vpop.f32.mrf.mxu1 }
  0xe8   :  { %v256_v56 = vpop.f32.mrf.mxu1 }
  0xea   :  { %v782_v57 = vpop.f32.mrf.mxu1 }
  0xeb   :  { %v1069_v58 = vadd.f32 %v782_v57, %v750_v41 }
  0xec   :  { %v379_v59 = vpop.f32.mrf.mxu1 }
  0xed   :  { %v1071_v60 = vadd.f32 %v379_v59, %v186_v42 }
  0xee   :  { %v785_v61 = vpop.f32.mrf.mxu1 }
  0xef   :  { %v1073_v62 = vadd.f32 %v785_v61, %v753_v43  ;;  %v464_v57 = vadd.f32 %v1080_v13, %v1071_v60  ;;  %v496_v61 = vstv %s1153_s6 }
  0xf0   :  { %v389_v63 = vpop.f32.mrf.mxu1 }
  0xf1   :  { %v1075_v0 = vadd.f32 %v389_v63, %v196_v44  ;;  %v480_v59 = vmax.f32 %v464_v57, 0.0 }
  0xf2   :  { %v788_v1 = vpop.f32.mrf.mxu1 }
  0xf3   :  { %v405_v42 = vadd.f32 %v788_v1, %v1061_v45  ;;  %v467_v45 = vadd.f32 %v1080_v13, %v1073_v62 }
  0xf4   :  { %v399_v2 = vpop.f32.mrf.mxu1 }
  0xf6   :  { %v791_v3 = vpop.f32.mrf.mxu1 }
  0xf7   :  { %v415_v35 = vadd.f32 %v791_v3, %v1065_v47  ;;  %v469_v47 = vadd.f32 %v1080_v13, %v405_v42 }
  0xf8   :  { %v409_v4 = vpop.f32.mrf.mxu1 }
  0xf9   :  { %v471_v38 = vadd.f32 %v1080_v13, %v415_v35  ;;  %v410_v39 = vadd.f32 %v409_v4, %v1067_v48  ;;  %v485_v48 = vmax.f32 %v469_v47, 0.0 }
  0xfa   :  { %v794_v5 = vpop.f32.mrf.mxu1 }
  0xfb   :  { %v425_v29 = vadd.f32 %v794_v5, %v762_v49  ;;  %v487_v43 = vmax.f32 %v471_v38, 0.0  ;;  %v470_v44 = vadd.f32 %v1080_v13, %v410_v39  ;;  %v400_v49 = vadd.f32 %v399_v2, %v1063_v46 }
  0xfc   :  { %v419_v6 = vpop.f32.mrf.mxu1  ;;  %v483_v46 = vmax.f32 %v467_v45, 0.0 }
  0xfd   :  { %v473_v32 = vadd.f32 %v1080_v13, %v425_v29  ;;  %v420_v33 = vadd.f32 %v419_v6, %v226_v50  ;;  %v486_v50 = vmax.f32 %v470_v44, 0.0 }
  0xfe   :  { %v797_v7 = vpop.f32.mrf.mxu1 }
  0xff   :  { %v435_v23 = vadd.f32 %v797_v7, %v765_v51  ;;  %v489_v36 = vmax.f32 %v473_v32, 0.0  ;;  %v472_v37 = vadd.f32 %v1080_v13, %v420_v33  ;;  %v468_v51 = vadd.f32 %v1080_v13, %v400_v49 }
 0x100   :  { %v429_v8 = vpop.f32.mrf.mxu1 }
 0x101   :  { %v475_v26 = vadd.f32 %v1080_v13, %v435_v23  ;;  %v430_v27 = vadd.f32 %v429_v8, %v236_v52  ;;  %v488_v41 = vmax.f32 %v472_v37, 0.0  ;;  %v484_v52 = vmax.f32 %v468_v51, 0.0 }
 0x102   :  { %v800_v9 = vpop.f32.mrf.mxu1 }
 0x103   :  { %v445_v17 = vadd.f32 %v800_v9, %v768_v53  ;;  %v491_v30 = vmax.f32 %v475_v26, 0.0  ;;  %v474_v31 = vadd.f32 %v1080_v13, %v430_v27  ;;  %v466_v53 = vadd.f32 %v1080_v13, %v1075_v0 }
 0x104   :  { %v439_v10 = vpop.f32.mrf.mxu1 }
 0x105   :  { %v477_v20 = vadd.f32 %v1080_v13, %v445_v17  ;;  %v440_v21 = vadd.f32 %v439_v10, %v246_v54  ;;  %v490_v34 = vmax.f32 %v474_v31, 0.0  ;;  %v465_v54 = vadd.f32 %v1080_v13, %v1069_v58  ;;  %v69_v58 = vld [vmem:[%s1152_s5] sm:$0x1] }
 0x106   :  { %v803_v11 = vpop.f32.mrf.mxu1 }
 0x107   :  { %v455_v12 = vadd.f32 %v803_v11, %v771_v55  ;;  %v493_v24 = vmax.f32 %v477_v20, 0.0  ;;  %v476_v25 = vadd.f32 %v1080_v13, %v440_v21  ;;  %v482_v55 = vmax.f32 %v466_v53, 0.0 }
 0x108   :  { %v449_v14 = vpop.f32.mrf.mxu1 }
 0x109   :  { %v479_v15 = vadd.f32 %v1080_v13, %v455_v12  ;;  %v450_v16 = vadd.f32 %v449_v14, %v256_v56  ;;  %v492_v28 = vmax.f32 %v476_v25, 0.0  ;;  %v481_v56 = vmax.f32 %v465_v54, 0.0 }
 0x10b   :  { %v495_v18 = vmax.f32 %v479_v15, 0.0  ;;  %v478_v19 = vadd.f32 %v1080_v13, %v450_v16 }
 0x10d   :  { %805 = vmatpush3.xpose.msk.msra.mxu0 %vm71_vm0, %v495_v18  ;;  %v494_v22 = vmax.f32 %v478_v19, 0.0 }
 0x10e   :  { %806 = vmatprep.subr.mxu0 %v864_v40 }
 0x111   :  { %807 = vmatpush3.xpose.msk.msra.mxu0 %vm71_vm0, %v494_v22 }
 0x112   :  { %808 = vmatprep.subr.mxu0 %v864_v40 }
 0x115   :  { %809 = vmatpush3.xpose.msk.msra.mxu0 %vm71_vm0, %v493_v24 }
 0x116   :  { %810 = vmatprep.subr.mxu0 %v864_v40 }
 0x119   :  { %811 = vmatpush3.xpose.msk.msra.mxu0 %vm71_vm0, %v492_v28 }
 0x11a   :  { %812 = vmatprep.subr.mxu0 %v864_v40 }
 0x11d   :  { %813 = vmatpush3.xpose.msk.msra.mxu0 %vm71_vm0, %v491_v30 }
 0x11e   :  { %814 = vmatprep.subr.mxu0 %v864_v40 }
 0x121   :  { %815 = vmatpush3.xpose.msk.msra.mxu0 %vm71_vm0, %v490_v34 }
 0x122   :  { %816 = vmatprep.subr.mxu0 %v864_v40 }
 0x125   :  { %817 = vmatpush3.xpose.msk.msra.mxu0 %vm71_vm0, %v489_v36 }
 0x126   :  { %818 = vmatprep.subr.mxu0 %v864_v40 }
 0x129   :  { %819 = vmatpush3.xpose.msk.msra.mxu0 %vm71_vm0, %v488_v41 }
 0x12a   :  { %820 = vmatprep.subr.mxu0 %v864_v40 }
 0x12d   :  { %821 = vmatpush3.xpose.msk.msra.mxu0 %vm71_vm0, %v487_v43 }
 0x12e   :  { %822 = vmatprep.subr.mxu0 %v864_v40 }
 0x131   :  { %823 = vmatpush3.xpose.msk.msra.mxu0 %vm71_vm0, %v486_v50 }
 0x132   :  { %824 = vmatprep.subr.mxu0 %v864_v40 }
 0x135   :  { %825 = vmatpush3.xpose.msk.msra.mxu0 %vm71_vm0, %v485_v48 }
 0x136   :  { %826 = vmatprep.subr.mxu0 %v864_v40 }
 0x139   :  { %827 = vmatpush3.xpose.msk.msra.mxu0 %vm71_vm0, %v484_v52 }
 0x13a   :  { %828 = vmatprep.subr.mxu0 %v864_v40 }
 0x13d   :  { %829 = vmatpush3.xpose.msk.msra.mxu0 %vm71_vm0, %v483_v46 }
 0x13e   :  { %830 = vmatprep.subr.mxu0 %v864_v40 }
 0x141   :  { %831 = vmatpush3.xpose.msk.msra.mxu0 %vm71_vm0, %v482_v55 }
 0x142   :  { %832 = vmatprep.subr.mxu0 %v864_v40 }
 0x145   :  { %833 = vmatpush3.xpose.msk.msra.mxu0 %vm71_vm0, %v481_v56 }
 0x146   :  { %834 = vmatprep.subr.mxu0 %v864_v40 }
 0x149   :  { %835 = vmatpush3.xpose.msk.msra.mxu0 %vm71_vm0, %v480_v59 }
 0x14c   :  { %837 = vmatmul.mubr.msk.f32.vlgmr.msra.gmra.mxu0 %vm71_vm0, %v69_v58 }
 0x20c   :  { %v614_v60 = vpop.f32.mrf.mxu0 }
 0x20d   :  { %v615_v62 = vadd.f32 %v614_v60, %v496_v61 }
 0x20e   :  { %v838_v63 = vpop.f32.mrf.mxu0 }
 0x20f   :  { %618 = vst [vmem:[#allocation3] sm:$0x1] %v615_v62 }
 0x210   :  { %853 = shalt.err (!%p850_p4)
}
 0x211   :  { %628 = dma.vmem_to_hbm [thread:$0]  %s626_s9, 16, %s1154_s7, [#allocation4]  }
 0x212   :  { %862 = dma.done.wait [#allocation4], 16  }
 0x213   :  { %863 = vsyncadd [#allocation4], 4294967280 }
 0x214   :  { %632 = vsyncpa [#allocation4], 1 }

</bundles_post_ra>
